<compile_context>
chip_gen: v7x
topology: tpu7x:2x2x1
jax: 0.10.0
libtpu: 0.0.40
codegen_flags: <defaults>
</compile_context>

<pallas_src>
import functools

import jax
import jax.numpy as jnp
import numpy as np
from jax.experimental import pallas as pl
from jax.experimental.pallas import tpu as pltpu


def lstm_last_step_kernel(x_ref, p_ref, out_ref, *, F, H):
    """Full LSTM recurrence over the sequence in one kernel invocation.

    x_ref:   (S, F)          f32  input sequence (batch == 1, squeezed)
    p_ref:   (P, 4H)         f32  packed parameters:
               row 0        : (b_ih + b_hh) * pre_scale
               row 1        : post_scale  (0.5 on i/f/o lanes, 1.0 on g lanes)
               row 2        : post_offset (0.5 on i/f/o lanes, 0.0 on g lanes)
               rows 3..7    : zero padding (keeps Wih 8-aligned in sublanes)
               rows 8..8+F  : Wih^T * pre_scale   (F, 4H)
               rows 8+F..   : Whh^T * pre_scale   (H, 4H)
    out_ref: (1, H)          f32  h at last time step
    """
    S = x_ref.shape[0]

    b = p_ref[0:1, :]                 # (1, 4H)  pre-scaled combined bias
    post_s = p_ref[1:2, :]            # (1, 4H)
    post_o = p_ref[2:3, :]            # (1, 4H)
    wih = p_ref[8:8 + F, :]           # (F, 4H)  pre-scaled
    whh = p_ref[8 + F:8 + F + H, :]   # (H, 4H)  pre-scaled

    # Hoisted input projection for all timesteps + bias, one MXU matmul: (S, 4H).
    # Result is already multiplied by the per-lane pre-scale (folded into wih / b).
    xg = jnp.dot(x_ref[...], wih, preferred_element_type=jnp.float32) + b

    # Recurrent state kept as register values (no VMEM round trips on the serial chain).
    h = jnp.zeros((1, H), jnp.float32)
    c = jnp.zeros((1, H), jnp.float32)

    # Fully unrolled: S is a small static Python int.
    for t in range(S):
        # Recurrent GEMV on the VPU (H is tiny & static), balanced tree reduction.
        terms = [h[:, k:k + 1] * whh[k:k + 1, :] for k in range(H)]  # each (1, 4H)
        while len(terms) > 1:
            nxt = [terms[i] + terms[i + 1] for i in range(0, len(terms) - 1, 2)]
            if len(terms) % 2:
                nxt.append(terms[-1])
            terms = nxt
        rec = terms[0]                                               # (1, 4H)

        gates = xg[t:t + 1, :] + rec                                 # (1, 4H), pre-scaled

        # Fused gate activation: one EUP tanh + one 4H-wide VPU FMA.
        #   sigmoid lanes (i, f, o): 0.5 * tanh(0.5 * z) + 0.5
        #   tanh lanes    (g)      : 1.0 * tanh(z)       + 0.0
        act = jnp.tanh(gates) * post_s + post_o

        i_g = act[:, 0 * H:1 * H]
        f_g = act[:, 1 * H:2 * H]
        g_g = act[:, 2 * H:3 * H]
        o_g = act[:, 3 * H:4 * H]

        c = f_g * c + i_g * g_g
        h = o_g * jnp.tanh(c)

    out_ref[...] = h


def prepare_net4_params(w_ih, w_hh, b_ih, b_hh):
    """One-time parameter preprocessing (transpose, bias-combine, pre-scale fold, pack).

    PyTorch LSTM parameter shapes: w_ih (4H, F), w_hh (4H, H), b_ih (4H,), b_hh (4H,).
    Returns (packed_params, F, H) with packed_params of shape (pad8(8+F+H), 4H) f32.
    """
    H4, F = w_ih.shape
    H = H4 // 4

    # Per-output-lane scales for the sigmoid-via-tanh fusion.
    pre = np.ones((H4,), np.float32)
    pre[0:2 * H] = 0.5          # i, f lanes
    pre[3 * H:4 * H] = 0.5      # o lanes
    post_s = pre.copy()         # 0.5 on sigmoid lanes, 1.0 on g lanes
    post_o = np.zeros((H4,), np.float32)
    post_o[0:2 * H] = 0.5
    post_o[3 * H:4 * H] = 0.5

    pre_j = jnp.asarray(pre)[None, :]                                   # (1, 4H)
    wih_t = jnp.asarray(w_ih, jnp.float32).T * pre_j                    # (F, 4H)
    whh_t = jnp.asarray(w_hh, jnp.float32).T * pre_j                    # (H, 4H)
    b = ((jnp.asarray(b_ih, jnp.float32) + jnp.asarray(b_hh, jnp.float32))
         * jnp.asarray(pre)).reshape(1, H4)                             # (1, 4H)

    header = jnp.concatenate(
        [b, jnp.asarray(post_s).reshape(1, H4), jnp.asarray(post_o).reshape(1, H4)],
        axis=0)                                                         # (3, 4H)
    hdr_pad = jnp.zeros((5, H4), jnp.float32)                           # align Wih to row 8
    rows = 8 + F + H
    tail_pad = jnp.zeros(((-rows) % 8, H4), jnp.float32)

    packed = jnp.concatenate([header, hdr_pad, wih_t, whh_t, tail_pad], axis=0)
    return packed, F, H


def net4_forward(x, packed_params, F, H):
    """x: (S, F). Returns (1, H) == ula[:, -1, :] of the PyTorch module."""
    kernel = functools.partial(lstm_last_step_kernel, F=F, H=H)
    vmem_spec = pl.BlockSpec(memory_space=pltpu.MemorySpace.VMEM)
    return pl.pallas_call(
        kernel,
        out_shape=jax.ShapeDtypeStruct((1, H), jnp.float32),
        in_specs=[vmem_spec, vmem_spec],
        out_specs=vmem_spec,
    )(jnp.asarray(x, jnp.float32), packed_params)


def net4_reference(x, w_ih, w_hh, b_ih, b_hh):
    """Pure-JAX reference of the same LSTM forward (for validation)."""
    H = w_hh.shape[1]
    h = jnp.zeros((1, H), jnp.float32)
    c = jnp.zeros((1, H), jnp.float32)
    for t in range(x.shape[0]):
        gates = x[t:t + 1] @ w_ih.T + h @ w_hh.T + b_ih + b_hh
        i_g = jax.nn.sigmoid(gates[:, 0 * H:1 * H])
        f_g = jax.nn.sigmoid(gates[:, 1 * H:2 * H])
        g_g = jnp.tanh(gates[:, 2 * H:3 * H])
        o_g = jax.nn.sigmoid(gates[:, 3 * H:4 * H])
        c = f_g * c + i_g * g_g
        h = o_g * jnp.tanh(c)
    return h


if __name__ == "__main__":
    # Small shapes consistent with the module (Number_of_features, hidden_size_1, seq_length).
    F, H, S = 32, 4, 8

    key = jax.random.PRNGKey(0)
    k_x, k_wih, k_whh, k_bih, k_bhh = jax.random.split(key, 5)

    x = jax.random.normal(k_x, (S, F), jnp.float32)
    # PyTorch LSTM parameter shapes: (4H, F), (4H, H), (4H,), (4H,)
    scale = 1.0 / np.sqrt(H)
    w_ih = jax.random.uniform(k_wih, (4 * H, F), jnp.float32, -scale, scale)
    w_hh = jax.random.uniform(k_whh, (4 * H, H), jnp.float32, -scale, scale)
    b_ih = jax.random.uniform(k_bih, (4 * H,), jnp.float32, -scale, scale)
    b_hh = jax.random.uniform(k_bhh, (4 * H,), jnp.float32, -scale, scale)

    # Done once at "parameter-load time", not per forward call.
    packed, F_, H_ = prepare_net4_params(w_ih, w_hh, b_ih, b_hh)
    packed = jax.block_until_ready(packed)

    out = net4_forward(x, packed, F_, H_)
    out = jax.block_until_ready(out)

    ref = net4_reference(x, w_ih, w_hh, b_ih, b_hh)
    np.testing.assert_allclose(np.asarray(out), np.asarray(ref), rtol=1e-5, atol=1e-5)

    print("KERNEL_OK")
</pallas_src>

<mosaic_0001>
module attributes {stable_mosaic.version = 11 : i64} {
  func.func @lstm_last_step_kernel(%arg0: memref<8x32xf32, #tpu.memory_space<vmem>>, %arg1: memref<48x16xf32, #tpu.memory_space<vmem>>, %arg2: memref<1x4xf32, #tpu.memory_space<vmem>>) attributes {dimension_semantics = [], scalar_prefetch = 0 : i64, scratch_operands = 0 : i64, tpu.core_type = #tpu.core_type<tc>} {
    %c0 = arith.constant 0 : index
    %c0_0 = arith.constant 0 : index
    %0 = vector.load %arg1[%c0, %c0_0] : memref<48x16xf32, #tpu.memory_space<vmem>>, vector<1x16xf32>
    %c1 = arith.constant 1 : index
    %c0_1 = arith.constant 0 : index
    %1 = vector.load %arg1[%c1, %c0_1] : memref<48x16xf32, #tpu.memory_space<vmem>>, vector<1x16xf32>
    %c2 = arith.constant 2 : index
    %c0_2 = arith.constant 0 : index
    %2 = vector.load %arg1[%c2, %c0_2] : memref<48x16xf32, #tpu.memory_space<vmem>>, vector<1x16xf32>
    %c8 = arith.constant 8 : index
    %c0_3 = arith.constant 0 : index
    %3 = vector.load %arg1[%c8, %c0_3] : memref<48x16xf32, #tpu.memory_space<vmem>>, vector<32x16xf32>
    %c40 = arith.constant 40 : index
    %c0_4 = arith.constant 0 : index
    %4 = vector.load %arg1[%c40, %c0_4] : memref<48x16xf32, #tpu.memory_space<vmem>>, vector<4x16xf32>
    %c0_5 = arith.constant 0 : index
    %c0_6 = arith.constant 0 : index
    %5 = vector.load %arg0[%c0_5, %c0_6] : memref<8x32xf32, #tpu.memory_space<vmem>>, vector<8x32xf32>
    %cst = arith.constant dense<0.000000e+00> : vector<8x16xf32>
    %6 = tpu.matmul %5, %3, %cst {dimension_numbers = #tpu.dot_dimension_numbers<[1], [0], [0], [1], [0, 0, 1, 1], [], []>} : vector<8x32xf32>, vector<32x16xf32>, vector<8x16xf32> -> vector<8x16xf32>
    %7 = vector.broadcast %0 : vector<1x16xf32> to vector<8x16xf32>
    %8 = arith.addf %6, %7 : vector<8x16xf32>
    %cst_7 = arith.constant 0.000000e+00 : f32
    %9 = vector.broadcast %cst_7 : f32 to vector<1x4xf32>
    %cst_8 = arith.constant 0.000000e+00 : f32
    %10 = vector.broadcast %cst_8 : f32 to vector<1x4xf32>
    %11 = vector.extract_strided_slice %9 {offsets = [0, 0], sizes = [1, 1], strides = [1, 1]} : vector<1x4xf32> to vector<1x1xf32>
    %12 = vector.extract_strided_slice %4 {offsets = [0, 0], sizes = [1, 16], strides = [1, 1]} : vector<4x16xf32> to vector<1x16xf32>
    %13 = vector.broadcast %11 : vector<1x1xf32> to vector<1x16xf32>
    %14 = arith.mulf %13, %12 : vector<1x16xf32>
    %15 = vector.extract_strided_slice %9 {offsets = [0, 1], sizes = [1, 1], strides = [1, 1]} : vector<1x4xf32> to vector<1x1xf32>
    %16 = vector.extract_strided_slice %4 {offsets = [1, 0], sizes = [1, 16], strides = [1, 1]} : vector<4x16xf32> to vector<1x16xf32>
    %17 = vector.broadcast %15 : vector<1x1xf32> to vector<1x16xf32>
    %18 = arith.mulf %17, %16 : vector<1x16xf32>
    %19 = vector.extract_strided_slice %9 {offsets = [0, 2], sizes = [1, 1], strides = [1, 1]} : vector<1x4xf32> to vector<1x1xf32>
    %20 = vector.extract_strided_slice %4 {offsets = [2, 0], sizes = [1, 16], strides = [1, 1]} : vector<4x16xf32> to vector<1x16xf32>
    %21 = vector.broadcast %19 : vector<1x1xf32> to vector<1x16xf32>
    %22 = arith.mulf %21, %20 : vector<1x16xf32>
    %23 = vector.extract_strided_slice %9 {offsets = [0, 3], sizes = [1, 1], strides = [1, 1]} : vector<1x4xf32> to vector<1x1xf32>
    %24 = vector.extract_strided_slice %4 {offsets = [3, 0], sizes = [1, 16], strides = [1, 1]} : vector<4x16xf32> to vector<1x16xf32>
    %25 = vector.broadcast %23 : vector<1x1xf32> to vector<1x16xf32>
    %26 = arith.mulf %25, %24 : vector<1x16xf32>
    %27 = arith.addf %14, %18 : vector<1x16xf32>
    %28 = arith.addf %22, %26 : vector<1x16xf32>
    %29 = arith.addf %27, %28 : vector<1x16xf32>
    %30 = vector.extract_strided_slice %8 {offsets = [0, 0], sizes = [1, 16], strides = [1, 1]} : vector<8x16xf32> to vector<1x16xf32>
    %31 = arith.addf %30, %29 : vector<1x16xf32>
    %32 = math.tanh %31 : vector<1x16xf32>
    %33 = arith.mulf %32, %1 : vector<1x16xf32>
    %34 = arith.addf %33, %2 : vector<1x16xf32>
    %35 = vector.extract_strided_slice %34 {offsets = [0, 0], sizes = [1, 4], strides = [1, 1]} : vector<1x16xf32> to vector<1x4xf32>
    %36 = vector.extract_strided_slice %34 {offsets = [0, 4], sizes = [1, 4], strides = [1, 1]} : vector<1x16xf32> to vector<1x4xf32>
    %37 = vector.extract_strided_slice %34 {offsets = [0, 8], sizes = [1, 4], strides = [1, 1]} : vector<1x16xf32> to vector<1x4xf32>
    %38 = vector.extract_strided_slice %34 {offsets = [0, 12], sizes = [1, 4], strides = [1, 1]} : vector<1x16xf32> to vector<1x4xf32>
    %39 = arith.mulf %36, %10 : vector<1x4xf32>
    %40 = arith.mulf %35, %37 : vector<1x4xf32>
    %41 = arith.addf %39, %40 : vector<1x4xf32>
    %42 = math.tanh %41 : vector<1x4xf32>
    %43 = arith.mulf %38, %42 : vector<1x4xf32>
    %44 = vector.extract_strided_slice %43 {offsets = [0, 0], sizes = [1, 1], strides = [1, 1]} : vector<1x4xf32> to vector<1x1xf32>
    %45 = vector.extract_strided_slice %4 {offsets = [0, 0], sizes = [1, 16], strides = [1, 1]} : vector<4x16xf32> to vector<1x16xf32>
    %46 = vector.broadcast %44 : vector<1x1xf32> to vector<1x16xf32>
    %47 = arith.mulf %46, %45 : vector<1x16xf32>
    %48 = vector.extract_strided_slice %43 {offsets = [0, 1], sizes = [1, 1], strides = [1, 1]} : vector<1x4xf32> to vector<1x1xf32>
    %49 = vector.extract_strided_slice %4 {offsets = [1, 0], sizes = [1, 16], strides = [1, 1]} : vector<4x16xf32> to vector<1x16xf32>
    %50 = vector.broadcast %48 : vector<1x1xf32> to vector<1x16xf32>
    %51 = arith.mulf %50, %49 : vector<1x16xf32>
    %52 = vector.extract_strided_slice %43 {offsets = [0, 2], sizes = [1, 1], strides = [1, 1]} : vector<1x4xf32> to vector<1x1xf32>
    %53 = vector.extract_strided_slice %4 {offsets = [2, 0], sizes = [1, 16], strides = [1, 1]} : vector<4x16xf32> to vector<1x16xf32>
    %54 = vector.broadcast %52 : vector<1x1xf32> to vector<1x16xf32>
    %55 = arith.mulf %54, %53 : vector<1x16xf32>
    %56 = vector.extract_strided_slice %43 {offsets = [0, 3], sizes = [1, 1], strides = [1, 1]} : vector<1x4xf32> to vector<1x1xf32>
    %57 = vector.extract_strided_slice %4 {offsets = [3, 0], sizes = [1, 16], strides = [1, 1]} : vector<4x16xf32> to vector<1x16xf32>
    %58 = vector.broadcast %56 : vector<1x1xf32> to vector<1x16xf32>
    %59 = arith.mulf %58, %57 : vector<1x16xf32>
    %60 = arith.addf %47, %51 : vector<1x16xf32>
    %61 = arith.addf %55, %59 : vector<1x16xf32>
    %62 = arith.addf %60, %61 : vector<1x16xf32>
    %63 = vector.extract_strided_slice %8 {offsets = [1, 0], sizes = [1, 16], strides = [1, 1]} : vector<8x16xf32> to vector<1x16xf32>
    %64 = arith.addf %63, %62 : vector<1x16xf32>
    %65 = math.tanh %64 : vector<1x16xf32>
    %66 = arith.mulf %65, %1 : vector<1x16xf32>
    %67 = arith.addf %66, %2 : vector<1x16xf32>
    %68 = vector.extract_strided_slice %67 {offsets = [0, 0], sizes = [1, 4], strides = [1, 1]} : vector<1x16xf32> to vector<1x4xf32>
    %69 = vector.extract_strided_slice %67 {offsets = [0, 4], sizes = [1, 4], strides = [1, 1]} : vector<1x16xf32> to vector<1x4xf32>
    %70 = vector.extract_strided_slice %67 {offsets = [0, 8], sizes = [1, 4], strides = [1, 1]} : vector<1x16xf32> to vector<1x4xf32>
    %71 = vector.extract_strided_slice %67 {offsets = [0, 12], sizes = [1, 4], strides = [1, 1]} : vector<1x16xf32> to vector<1x4xf32>
    %72 = arith.mulf %69, %41 : vector<1x4xf32>
    %73 = arith.mulf %68, %70 : vector<1x4xf32>
    %74 = arith.addf %72, %73 : vector<1x4xf32>
    %75 = math.tanh %74 : vector<1x4xf32>
    %76 = arith.mulf %71, %75 : vector<1x4xf32>
    %77 = vector.extract_strided_slice %76 {offsets = [0, 0], sizes = [1, 1], strides = [1, 1]} : vector<1x4xf32> to vector<1x1xf32>
    %78 = vector.extract_strided_slice %4 {offsets = [0, 0], sizes = [1, 16], strides = [1, 1]} : vector<4x16xf32> to vector<1x16xf32>
    %79 = vector.broadcast %77 : vector<1x1xf32> to vector<1x16xf32>
    %80 = arith.mulf %79, %78 : vector<1x16xf32>
    %81 = vector.extract_strided_slice %76 {offsets = [0, 1], sizes = [1, 1], strides = [1, 1]} : vector<1x4xf32> to vector<1x1xf32>
    %82 = vector.extract_strided_slice %4 {offsets = [1, 0], sizes = [1, 16], strides = [1, 1]} : vector<4x16xf32> to vector<1x16xf32>
    %83 = vector.broadcast %81 : vector<1x1xf32> to vector<1x16xf32>
    %84 = arith.mulf %83, %82 : vector<1x16xf32>
    %85 = vector.extract_strided_slice %76 {offsets = [0, 2], sizes = [1, 1], strides = [1, 1]} : vector<1x4xf32> to vector<1x1xf32>
    %86 = vector.extract_strided_slice %4 {offsets = [2, 0], sizes = [1, 16], strides = [1, 1]} : vector<4x16xf32> to vector<1x16xf32>
    %87 = vector.broadcast %85 : vector<1x1xf32> to vector<1x16xf32>
    %88 = arith.mulf %87, %86 : vector<1x16xf32>
    %89 = vector.extract_strided_slice %76 {offsets = [0, 3], sizes = [1, 1], strides = [1, 1]} : vector<1x4xf32> to vector<1x1xf32>
    %90 = vector.extract_strided_slice %4 {offsets = [3, 0], sizes = [1, 16], strides = [1, 1]} : vector<4x16xf32> to vector<1x16xf32>
    %91 = vector.broadcast %89 : vector<1x1xf32> to vector<1x16xf32>
    %92 = arith.mulf %91, %90 : vector<1x16xf32>
    %93 = arith.addf %80, %84 : vector<1x16xf32>
    %94 = arith.addf %88, %92 : vector<1x16xf32>
    %95 = arith.addf %93, %94 : vector<1x16xf32>
    %96 = vector.extract_strided_slice %8 {offsets = [2, 0], sizes = [1, 16], strides = [1, 1]} : vector<8x16xf32> to vector<1x16xf32>
    %97 = arith.addf %96, %95 : vector<1x16xf32>
    %98 = math.tanh %97 : vector<1x16xf32>
    %99 = arith.mulf %98, %1 : vector<1x16xf32>
    %100 = arith.addf %99, %2 : vector<1x16xf32>
    %101 = vector.extract_strided_slice %100 {offsets = [0, 0], sizes = [1, 4], strides = [1, 1]} : vector<1x16xf32> to vector<1x4xf32>
    %102 = vector.extract_strided_slice %100 {offsets = [0, 4], sizes = [1, 4], strides = [1, 1]} : vector<1x16xf32> to vector<1x4xf32>
    %103 = vector.extract_strided_slice %100 {offsets = [0, 8], sizes = [1, 4], strides = [1, 1]} : vector<1x16xf32> to vector<1x4xf32>
    %104 = vector.extract_strided_slice %100 {offsets = [0, 12], sizes = [1, 4], strides = [1, 1]} : vector<1x16xf32> to vector<1x4xf32>
    %105 = arith.mulf %102, %74 : vector<1x4xf32>
    %106 = arith.mulf %101, %103 : vector<1x4xf32>
    %107 = arith.addf %105, %106 : vector<1x4xf32>
    %108 = math.tanh %107 : vector<1x4xf32>
    %109 = arith.mulf %104, %108 : vector<1x4xf32>
    %110 = vector.extract_strided_slice %109 {offsets = [0, 0], sizes = [1, 1], strides = [1, 1]} : vector<1x4xf32> to vector<1x1xf32>
    %111 = vector.extract_strided_slice %4 {offsets = [0, 0], sizes = [1, 16], strides = [1, 1]} : vector<4x16xf32> to vector<1x16xf32>
    %112 = vector.broadcast %110 : vector<1x1xf32> to vector<1x16xf32>
    %113 = arith.mulf %112, %111 : vector<1x16xf32>
    %114 = vector.extract_strided_slice %109 {offsets = [0, 1], sizes = [1, 1], strides = [1, 1]} : vector<1x4xf32> to vector<1x1xf32>
    %115 = vector.extract_strided_slice %4 {offsets = [1, 0], sizes = [1, 16], strides = [1, 1]} : vector<4x16xf32> to vector<1x16xf32>
    %116 = vector.broadcast %114 : vector<1x1xf32> to vector<1x16xf32>
    %117 = arith.mulf %116, %115 : vector<1x16xf32>
    %118 = vector.extract_strided_slice %109 {offsets = [0, 2], sizes = [1, 1], strides = [1, 1]} : vector<1x4xf32> to vector<1x1xf32>
    %119 = vector.extract_strided_slice %4 {offsets = [2, 0], sizes = [1, 16], strides = [1, 1]} : vector<4x16xf32> to vector<1x16xf32>
    %120 = vector.broadcast %118 : vector<1x1xf32> to vector<1x16xf32>
    %121 = arith.mulf %120, %119 : vector<1x16xf32>
    %122 = vector.extract_strided_slice %109 {offsets = [0, 3], sizes = [1, 1], strides = [1, 1]} : vector<1x4xf32> to vector<1x1xf32>
    %123 = vector.extract_strided_slice %4 {offsets = [3, 0], sizes = [1, 16], strides = [1, 1]} : vector<4x16xf32> to vector<1x16xf32>
    %124 = vector.broadcast %122 : vector<1x1xf32> to vector<1x16xf32>
    %125 = arith.mulf %124, %123 : vector<1x16xf32>
    %126 = arith.addf %113, %117 : vector<1x16xf32>
    %127 = arith.addf %121, %125 : vector<1x16xf32>
    %128 = arith.addf %126, %127 : vector<1x16xf32>
    %129 = vector.extract_strided_slice %8 {offsets = [3, 0], sizes = [1, 16], strides = [1, 1]} : vector<8x16xf32> to vector<1x16xf32>
    %130 = arith.addf %129, %128 : vector<1x16xf32>
    %131 = math.tanh %130 : vector<1x16xf32>
    %132 = arith.mulf %131, %1 : vector<1x16xf32>
    %133 = arith.addf %132, %2 : vector<1x16xf32>
    %134 = vector.extract_strided_slice %133 {offsets = [0, 0], sizes = [1, 4], strides = [1, 1]} : vector<1x16xf32> to vector<1x4xf32>
    %135 = vector.extract_strided_slice %133 {offsets = [0, 4], sizes = [1, 4], strides = [1, 1]} : vector<1x16xf32> to vector<1x4xf32>
    %136 = vector.extract_strided_slice %133 {offsets = [0, 8], sizes = [1, 4], strides = [1, 1]} : vector<1x16xf32> to vector<1x4xf32>
    %137 = vector.extract_strided_slice %133 {offsets = [0, 12], sizes = [1, 4], strides = [1, 1]} : vector<1x16xf32> to vector<1x4xf32>
    %138 = arith.mulf %135, %107 : vector<1x4xf32>
    %139 = arith.mulf %134, %136 : vector<1x4xf32>
    %140 = arith.addf %138, %139 : vector<1x4xf32>
    %141 = math.tanh %140 : vector<1x4xf32>
    %142 = arith.mulf %137, %141 : vector<1x4xf32>
    %143 = vector.extract_strided_slice %142 {offsets = [0, 0], sizes = [1, 1], strides = [1, 1]} : vector<1x4xf32> to vector<1x1xf32>
    %144 = vector.extract_strided_slice %4 {offsets = [0, 0], sizes = [1, 16], strides = [1, 1]} : vector<4x16xf32> to vector<1x16xf32>
    %145 = vector.broadcast %143 : vector<1x1xf32> to vector<1x16xf32>
    %146 = arith.mulf %145, %144 : vector<1x16xf32>
    %147 = vector.extract_strided_slice %142 {offsets = [0, 1], sizes = [1, 1], strides = [1, 1]} : vector<1x4xf32> to vector<1x1xf32>
    %148 = vector.extract_strided_slice %4 {offsets = [1, 0], sizes = [1, 16], strides = [1, 1]} : vector<4x16xf32> to vector<1x16xf32>
    %149 = vector.broadcast %147 : vector<1x1xf32> to vector<1x16xf32>
    %150 = arith.mulf %149, %148 : vector<1x16xf32>
    %151 = vector.extract_strided_slice %142 {offsets = [0, 2], sizes = [1, 1], strides = [1, 1]} : vector<1x4xf32> to vector<1x1xf32>
    %152 = vector.extract_strided_slice %4 {offsets = [2, 0], sizes = [1, 16], strides = [1, 1]} : vector<4x16xf32> to vector<1x16xf32>
    %153 = vector.broadcast %151 : vector<1x1xf32> to vector<1x16xf32>
    %154 = arith.mulf %153, %152 : vector<1x16xf32>
    %155 = vector.extract_strided_slice %142 {offsets = [0, 3], sizes = [1, 1], strides = [1, 1]} : vector<1x4xf32> to vector<1x1xf32>
    %156 = vector.extract_strided_slice %4 {offsets = [3, 0], sizes = [1, 16], strides = [1, 1]} : vector<4x16xf32> to vector<1x16xf32>
    %157 = vector.broadcast %155 : vector<1x1xf32> to vector<1x16xf32>
    %158 = arith.mulf %157, %156 : vector<1x16xf32>
    %159 = arith.addf %146, %150 : vector<1x16xf32>
    %160 = arith.addf %154, %158 : vector<1x16xf32>
    %161 = arith.addf %159, %160 : vector<1x16xf32>
    %162 = vector.extract_strided_slice %8 {offsets = [4, 0], sizes = [1, 16], strides = [1, 1]} : vector<8x16xf32> to vector<1x16xf32>
    %163 = arith.addf %162, %161 : vector<1x16xf32>
    %164 = math.tanh %163 : vector<1x16xf32>
    %165 = arith.mulf %164, %1 : vector<1x16xf32>
    %166 = arith.addf %165, %2 : vector<1x16xf32>
    %167 = vector.extract_strided_slice %166 {offsets = [0, 0], sizes = [1, 4], strides = [1, 1]} : vector<1x16xf32> to vector<1x4xf32>
    %168 = vector.extract_strided_slice %166 {offsets = [0, 4], sizes = [1, 4], strides = [1, 1]} : vector<1x16xf32> to vector<1x4xf32>
    %169 = vector.extract_strided_slice %166 {offsets = [0, 8], sizes = [1, 4], strides = [1, 1]} : vector<1x16xf32> to vector<1x4xf32>
    %170 = vector.extract_strided_slice %166 {offsets = [0, 12], sizes = [1, 4], strides = [1, 1]} : vector<1x16xf32> to vector<1x4xf32>
    %171 = arith.mulf %168, %140 : vector<1x4xf32>
    %172 = arith.mulf %167, %169 : vector<1x4xf32>
    %173 = arith.addf %171, %172 : vector<1x4xf32>
    %174 = math.tanh %173 : vector<1x4xf32>
    %175 = arith.mulf %170, %174 : vector<1x4xf32>
    %176 = vector.extract_strided_slice %175 {offsets = [0, 0], sizes = [1, 1], strides = [1, 1]} : vector<1x4xf32> to vector<1x1xf32>
    %177 = vector.extract_strided_slice %4 {offsets = [0, 0], sizes = [1, 16], strides = [1, 1]} : vector<4x16xf32> to vector<1x16xf32>
    %178 = vector.broadcast %176 : vector<1x1xf32> to vector<1x16xf32>
    %179 = arith.mulf %178, %177 : vector<1x16xf32>
    %180 = vector.extract_strided_slice %175 {offsets = [0, 1], sizes = [1, 1], strides = [1, 1]} : vector<1x4xf32> to vector<1x1xf32>
    %181 = vector.extract_strided_slice %4 {offsets = [1, 0], sizes = [1, 16], strides = [1, 1]} : vector<4x16xf32> to vector<1x16xf32>
    %182 = vector.broadcast %180 : vector<1x1xf32> to vector<1x16xf32>
    %183 = arith.mulf %182, %181 : vector<1x16xf32>
    %184 = vector.extract_strided_slice %175 {offsets = [0, 2], sizes = [1, 1], strides = [1, 1]} : vector<1x4xf32> to vector<1x1xf32>
    %185 = vector.extract_strided_slice %4 {offsets = [2, 0], sizes = [1, 16], strides = [1, 1]} : vector<4x16xf32> to vector<1x16xf32>
    %186 = vector.broadcast %184 : vector<1x1xf32> to vector<1x16xf32>
    %187 = arith.mulf %186, %185 : vector<1x16xf32>
    %188 = vector.extract_strided_slice %175 {offsets = [0, 3], sizes = [1, 1], strides = [1, 1]} : vector<1x4xf32> to vector<1x1xf32>
    %189 = vector.extract_strided_slice %4 {offsets = [3, 0], sizes = [1, 16], strides = [1, 1]} : vector<4x16xf32> to vector<1x16xf32>
    %190 = vector.broadcast %188 : vector<1x1xf32> to vector<1x16xf32>
    %191 = arith.mulf %190, %189 : vector<1x16xf32>
    %192 = arith.addf %179, %183 : vector<1x16xf32>
    %193 = arith.addf %187, %191 : vector<1x16xf32>
    %194 = arith.addf %192, %193 : vector<1x16xf32>
    %195 = vector.extract_strided_slice %8 {offsets = [5, 0], sizes = [1, 16], strides = [1, 1]} : vector<8x16xf32> to vector<1x16xf32>
    %196 = arith.addf %195, %194 : vector<1x16xf32>
    %197 = math.tanh %196 : vector<1x16xf32>
    %198 = arith.mulf %197, %1 : vector<1x16xf32>
    %199 = arith.addf %198, %2 : vector<1x16xf32>
    %200 = vector.extract_strided_slice %199 {offsets = [0, 0], sizes = [1, 4], strides = [1, 1]} : vector<1x16xf32> to vector<1x4xf32>
    %201 = vector.extract_strided_slice %199 {offsets = [0, 4], sizes = [1, 4], strides = [1, 1]} : vector<1x16xf32> to vector<1x4xf32>
    %202 = vector.extract_strided_slice %199 {offsets = [0, 8], sizes = [1, 4], strides = [1, 1]} : vector<1x16xf32> to vector<1x4xf32>
    %203 = vector.extract_strided_slice %199 {offsets = [0, 12], sizes = [1, 4], strides = [1, 1]} : vector<1x16xf32> to vector<1x4xf32>
    %204 = arith.mulf %201, %173 : vector<1x4xf32>
    %205 = arith.mulf %200, %202 : vector<1x4xf32>
    %206 = arith.addf %204, %205 : vector<1x4xf32>
    %207 = math.tanh %206 : vector<1x4xf32>
    %208 = arith.mulf %203, %207 : vector<1x4xf32>
    %209 = vector.extract_strided_slice %208 {offsets = [0, 0], sizes = [1, 1], strides = [1, 1]} : vector<1x4xf32> to vector<1x1xf32>
    %210 = vector.extract_strided_slice %4 {offsets = [0, 0], sizes = [1, 16], strides = [1, 1]} : vector<4x16xf32> to vector<1x16xf32>
    %211 = vector.broadcast %209 : vector<1x1xf32> to vector<1x16xf32>
    %212 = arith.mulf %211, %210 : vector<1x16xf32>
    %213 = vector.extract_strided_slice %208 {offsets = [0, 1], sizes = [1, 1], strides = [1, 1]} : vector<1x4xf32> to vector<1x1xf32>
    %214 = vector.extract_strided_slice %4 {offsets = [1, 0], sizes = [1, 16], strides = [1, 1]} : vector<4x16xf32> to vector<1x16xf32>
    %215 = vector.broadcast %213 : vector<1x1xf32> to vector<1x16xf32>
    %216 = arith.mulf %215, %214 : vector<1x16xf32>
    %217 = vector.extract_strided_slice %208 {offsets = [0, 2], sizes = [1, 1], strides = [1, 1]} : vector<1x4xf32> to vector<1x1xf32>
    %218 = vector.extract_strided_slice %4 {offsets = [2, 0], sizes = [1, 16], strides = [1, 1]} : vector<4x16xf32> to vector<1x16xf32>
    %219 = vector.broadcast %217 : vector<1x1xf32> to vector<1x16xf32>
    %220 = arith.mulf %219, %218 : vector<1x16xf32>
    %221 = vector.extract_strided_slice %208 {offsets = [0, 3], sizes = [1, 1], strides = [1, 1]} : vector<1x4xf32> to vector<1x1xf32>
    %222 = vector.extract_strided_slice %4 {offsets = [3, 0], sizes = [1, 16], strides = [1, 1]} : vector<4x16xf32> to vector<1x16xf32>
    %223 = vector.broadcast %221 : vector<1x1xf32> to vector<1x16xf32>
    %224 = arith.mulf %223, %222 : vector<1x16xf32>
    %225 = arith.addf %212, %216 : vector<1x16xf32>
    %226 = arith.addf %220, %224 : vector<1x16xf32>
    %227 = arith.addf %225, %226 : vector<1x16xf32>
    %228 = vector.extract_strided_slice %8 {offsets = [6, 0], sizes = [1, 16], strides = [1, 1]} : vector<8x16xf32> to vector<1x16xf32>
    %229 = arith.addf %228, %227 : vector<1x16xf32>
    %230 = math.tanh %229 : vector<1x16xf32>
    %231 = arith.mulf %230, %1 : vector<1x16xf32>
    %232 = arith.addf %231, %2 : vector<1x16xf32>
    %233 = vector.extract_strided_slice %232 {offsets = [0, 0], sizes = [1, 4], strides = [1, 1]} : vector<1x16xf32> to vector<1x4xf32>
    %234 = vector.extract_strided_slice %232 {offsets = [0, 4], sizes = [1, 4], strides = [1, 1]} : vector<1x16xf32> to vector<1x4xf32>
    %235 = vector.extract_strided_slice %232 {offsets = [0, 8], sizes = [1, 4], strides = [1, 1]} : vector<1x16xf32> to vector<1x4xf32>
    %236 = vector.extract_strided_slice %232 {offsets = [0, 12], sizes = [1, 4], strides = [1, 1]} : vector<1x16xf32> to vector<1x4xf32>
    %237 = arith.mulf %234, %206 : vector<1x4xf32>
    %238 = arith.mulf %233, %235 : vector<1x4xf32>
    %239 = arith.addf %237, %238 : vector<1x4xf32>
    %240 = math.tanh %239 : vector<1x4xf32>
    %241 = arith.mulf %236, %240 : vector<1x4xf32>
    %242 = vector.extract_strided_slice %241 {offsets = [0, 0], sizes = [1, 1], strides = [1, 1]} : vector<1x4xf32> to vector<1x1xf32>
    %243 = vector.extract_strided_slice %4 {offsets = [0, 0], sizes = [1, 16], strides = [1, 1]} : vector<4x16xf32> to vector<1x16xf32>
    %244 = vector.broadcast %242 : vector<1x1xf32> to vector<1x16xf32>
    %245 = arith.mulf %244, %243 : vector<1x16xf32>
    %246 = vector.extract_strided_slice %241 {offsets = [0, 1], sizes = [1, 1], strides = [1, 1]} : vector<1x4xf32> to vector<1x1xf32>
    %247 = vector.extract_strided_slice %4 {offsets = [1, 0], sizes = [1, 16], strides = [1, 1]} : vector<4x16xf32> to vector<1x16xf32>
    %248 = vector.broadcast %246 : vector<1x1xf32> to vector<1x16xf32>
    %249 = arith.mulf %248, %247 : vector<1x16xf32>
    %250 = vector.extract_strided_slice %241 {offsets = [0, 2], sizes = [1, 1], strides = [1, 1]} : vector<1x4xf32> to vector<1x1xf32>
    %251 = vector.extract_strided_slice %4 {offsets = [2, 0], sizes = [1, 16], strides = [1, 1]} : vector<4x16xf32> to vector<1x16xf32>
    %252 = vector.broadcast %250 : vector<1x1xf32> to vector<1x16xf32>
    %253 = arith.mulf %252, %251 : vector<1x16xf32>
    %254 = vector.extract_strided_slice %241 {offsets = [0, 3], sizes = [1, 1], strides = [1, 1]} : vector<1x4xf32> to vector<1x1xf32>
    %255 = vector.extract_strided_slice %4 {offsets = [3, 0], sizes = [1, 16], strides = [1, 1]} : vector<4x16xf32> to vector<1x16xf32>
    %256 = vector.broadcast %254 : vector<1x1xf32> to vector<1x16xf32>
    %257 = arith.mulf %256, %255 : vector<1x16xf32>
    %258 = arith.addf %245, %249 : vector<1x16xf32>
    %259 = arith.addf %253, %257 : vector<1x16xf32>
    %260 = arith.addf %258, %259 : vector<1x16xf32>
    %261 = vector.extract_strided_slice %8 {offsets = [7, 0], sizes = [1, 16], strides = [1, 1]} : vector<8x16xf32> to vector<1x16xf32>
    %262 = arith.addf %261, %260 : vector<1x16xf32>
    %263 = math.tanh %262 : vector<1x16xf32>
    %264 = arith.mulf %263, %1 : vector<1x16xf32>
    %265 = arith.addf %264, %2 : vector<1x16xf32>
    %266 = vector.extract_strided_slice %265 {offsets = [0, 0], sizes = [1, 4], strides = [1, 1]} : vector<1x16xf32> to vector<1x4xf32>
    %267 = vector.extract_strided_slice %265 {offsets = [0, 4], sizes = [1, 4], strides = [1, 1]} : vector<1x16xf32> to vector<1x4xf32>
    %268 = vector.extract_strided_slice %265 {offsets = [0, 8], sizes = [1, 4], strides = [1, 1]} : vector<1x16xf32> to vector<1x4xf32>
    %269 = vector.extract_strided_slice %265 {offsets = [0, 12], sizes = [1, 4], strides = [1, 1]} : vector<1x16xf32> to vector<1x4xf32>
    %270 = arith.mulf %267, %239 : vector<1x4xf32>
    %271 = arith.mulf %266, %268 : vector<1x4xf32>
    %272 = arith.addf %270, %271 : vector<1x4xf32>
    %273 = math.tanh %272 : vector<1x4xf32>
    %274 = arith.mulf %269, %273 : vector<1x4xf32>
    %c0_9 = arith.constant 0 : index
    %c0_10 = arith.constant 0 : index
    %275 = vector.load %arg2[%c0_9, %c0_10] : memref<1x4xf32, #tpu.memory_space<vmem>>, vector<1x4xf32>
    tpu.vector_store %arg2[%c0_9, %c0_10], %274 {strides = array<i32>} : memref<1x4xf32, #tpu.memory_space<vmem>>, vector<1x4xf32>,
    return
  }
}

</mosaic_0001>

<bundles_post_ra>
// kernel: tpu_custom_call.1
= control target key start
LH: loop header
LB: loop body
LE: loop exit
PB: predicated region body
PF: predicated region fallthrough
CT: control target
= control target key end

     0   :  { %v669_v3 = vmov 0.0|0.0   ;;  %vm670_vm0 = vmmov 0   ;;  %v671_v6 = vmov 0.0   ;;  %s867_s0 = inlined_call_operand.vmem [shape: f32[8,32], index: 0, kind: input, shape index: {}]   ;;  %s868_s1 = inlined_call_operand.vmem [shape: f32[48,16], index: 1, kind: input, shape index: {}]   ;;  %s869_s2 = inlined_call_operand.hbm [shape: f32[1,4], index: 2, kind: output, shape index: {}]  }
   0x1   :  { %v15_v0 = vld [vmem:[%s868_s1 + $0x8] sm:$0xff]  ;;  %v16_v1 = vld [vmem:[%s868_s1 + $0x10] sm:$0xff]  ;;  %v17_v2 = vld [vmem:[%s868_s1 + $0x18] sm:$0xff]  ;;  %569 = vmatprep.subr.bf16.mxu0 %v669_v3  ;;  %566 = vmatprep.mubr.msk.f32.mxu0 %vm670_vm0, %v671_v6 }
   0x2   :  { %v570_v4 = vpack.c.bf16 %v16_v1, %v15_v0  ;;  %v18_v5 = vld [vmem:[%s868_s1 + $0x20] sm:$0xff] }
   0x3   :  { %7 = vsyncpa [#allocation3], 0  ;;  %v573_v7 = vpack.c.bf16 %v18_v5, %v17_v2  ;;  %v20_v8 = vld [vmem:[%s867_s0] sm:$0xff]  ;;  %vm25_vm1 = vcmask 261120   ;;  %v714_v9 = vld [vmem:[%s868_s1 + $0x28] sm:$0xf] }
   0x4   :  { %571 = vmatpush3.bf16.msra.mxu0 %v570_v4  ;;  %v99_v10 = vmul.f32 0.0, %v714_v9  ;;  %v551_v14 = vld [vmem:[%s868_s1] ss:$0 sm:$0xff]  ;;  %v726_v20 = vld [vmem:[%s868_s1 + $0x1] sm:$0x1]  ;;  %s672_s26 = smov 120  }
   0x5   :  { %572 = vmatprep.subr.bf16.mxu0 %v669_v3  ;;  %v731_v22 = vld [vmem:[%s868_s1 + $0x2] sm:$0x1]  ;;  %s673_s27 = smov 4   ;;  %v674_v30 = vmov 13   ;;  %v675_v31 = vmov 12   ;;  %s676_s1 = smov 8  }
   0x6   :  { %v101_v11 = vrot.slane %v99_v10, 1  ;;  %588 = vset.pattern.permute.xlu0 %v674_v30  ;;  %587 = vset.pattern.permute.xlu1 %v675_v31  ;;  %v677_v35 = vmov 14   ;;  %v678_v36 = vmov 15   ;;  %v744_v38 = vrot.slane %v714_v9, 1  ;;  %s679_s28 = smov 116   ;;  %s680_s29 = smov [#allocation2]  }
   0x7   :  { %v747_v41 = vrot.slane %v714_v9, 2  ;;  %v750_v42 = vrot.slane %v714_v9, 3  ;;  %v166_v53 = vrot.slane %v726_v20, 7  ;;  %v170_v54 = vrot.slane %v731_v22, 7  ;;  %s543_s30 = sshll.u32 %s680_s29, 4  ;;  %s544_s30 = int_to_ptr.vmem [resolvable:$true] %s543_s30 }
   0x8   :  { %574 = vmatpush3.bf16.msra.mxu0 %v573_v7  ;;  %v103_v12 = vadd.f32 %v101_v11, %v99_v10  ;;  %v767_v4 = vrot.slane %v714_v9, 7  ;;  %vm535_vm2 = vcmask 31751   ;;  %s645_s3 = scalar_lea.vmem %s544_s30, 16  ;;  %s649_s4 = scalar_lea.vmem %s544_s30, 32 }
   0x9   :  { %p646_p0 = scmp.ne.s32.totalorder %s544_s30, %s645_s3  ;;  %p650_p1 = scmp.lt.s32.totalorder %s544_s30, %s544_s30 }
   0xa   :  { %v105_v13 = vrot.slane %v103_v12, 2  ;;  %p651_p2 = scmp.lt.s32.totalorder %s649_s4, %s645_s3 }
   0xb   :  { %567 = vmatmul.mubr.msk.f32.vlgmr.msra.gmra.mrb[0].mxu0 %vm25_vm1, %v20_v8 }
   0xc   :  { %v107_v15 = vadd.f32 %v105_v13, %v103_v12  ;;  %p652_p3 = por %p651_p2, %p650_p1 }
   0xe   :  { %p653_p4 = pnand %p652_p3, %p646_p0 }
  0xde   :  { %v95_v16 = vpop.f32.mrb[0].mxu0 }
  0xdf   :  { %v720_v17 = vadd.f32 %v551_v14, %v95_v16  ;;  %v568_v18 = vpop.f32.mrb[1].mxu0 }
  0xe1   :  { %v108_v19 = vadd.f32 %v107_v15, %v720_v17 }
  0xe3   :  { %613 = vtanh.f32 %v108_v19  ;;  %v224_v19 = vrot.slane %v726_v20, 6 }
  0xed   :  { %v614_v21 = vpop.eup %613 }
  0xee   :  { %v110_v23 = vmul.f32 %v614_v21, %v726_v20  ;;  %v227_v21 = vrot.slane %v731_v22, 6 }
  0xf0   :  { %v111_v24 = vadd.f32 %v110_v23, %v731_v22 }
  0xf2   :  { %114 = vrot.lane.b32.xlu0 %v111_v24, %s672_s26  ;;  %v112_v27 = vmul.f32 0.0, %v111_v24 }
 0x164   :  { %v115_v25 = vpop.permute.xlu0 %114 }
 0x165   :  { %v117_v26 = vmul.f32 %v115_v25, %v111_v24 }
 0x167   :  { %119 = vrot.lane.b32.xlu0 %v117_v26, %s673_s27 }
 0x1d9   :  { %v120_v28 = vpop.permute.xlu0 %119 }
 0x1da   :  { %v122_v29 = vadd.f32 %v120_v28, %v112_v27 }
 0x1dc   :  { %615 = vtanh.f32 %v122_v29  ;;  %v174_v60 = vrot.slane %v122_v29, 7 }
 0x1e6   :  { %v616_v32 = vpop.eup %615 }
 0x1e7   :  { %125 = vrot.lane.b32.xlu1 %v616_v32, %s676_s1 }
 0x259   :  { %v126_v33 = vpop.permute.xlu1 %125 }
 0x25a   :  { %v128_v34 = vmul.f32 %v126_v33, %v111_v24 }
 0x25c   :  { %136 = vperm.xlu0 %588, %v128_v34   ;;  %131 = vperm.xlu1 %587, %v128_v34  }
 0x260   :  { %589 = vset.pattern.permute.xlu1 %v677_v35 }
 0x261   :  { %144 = vperm.xlu1 %589, %v128_v34  }
 0x265   :  { %590 = vset.pattern.permute.xlu1 %v678_v36 }
 0x266   :  { %151 = vperm.xlu1 %590, %v128_v34  }
 0x26a   :  { %591 = vset.pattern.permute.xlu1 %v675_v31 }
 0x2db   :  { %v132_v37 = vpop.permute.xlu1 %131  ;;  %v137_v40 = vpop.permute.xlu0 %136 }
 0x2dc   :  { %v142_v43 = vmul.f32 %v744_v38, %v137_v40  ;;  %v134_v44 = vmul.f32 %v132_v37, %v714_v9 }
 0x2de   :  { %v157_v48 = vadd.f32 %v142_v43, %v134_v44  ;;  %v783_v43 = vrot.slane %v714_v9, 6 }
 0x2e0   :  { %v145_v39 = vpop.permute.xlu1 %144 }
 0x2e1   :  { %v149_v46 = vmul.f32 %v747_v41, %v145_v39 }
 0x2e5   :  { %v152_v45 = vpop.permute.xlu1 %151 }
 0x2e6   :  { %v156_v47 = vmul.f32 %v750_v42, %v152_v45 }
 0x2e8   :  { %v158_v49 = vadd.f32 %v156_v47, %v149_v46 }
 0x2ea   :  { %v159_v50 = vadd.f32 %v158_v49, %v157_v48 }
 0x2ec   :  { %v161_v51 = vrot.slane %v159_v50, 7 }
 0x2ee   :  { %v163_v52 = vadd.f32 %v161_v51, %v720_v17 }
 0x2f0   :  { %617 = vtanh.f32 %v163_v52 }
 0x2fa   :  { %v618_v55 = vpop.eup %617 }
 0x2fb   :  { %v168_v56 = vmul.f32 %v618_v55, %v166_v53 }
 0x2fd   :  { %v172_v57 = vadd.f32 %v170_v54, %v168_v56  ;;  %v281_v56 = vrot.slane %v726_v20, 5 }
 0x2ff   :  { %178 = vrot.lane.b32.xlu0 %v172_v57, %s672_s26  ;;  %v176_v61 = vmul.f32 %v174_v60, %v172_v57 }
 0x371   :  { %v179_v58 = vpop.permute.xlu0 %178 }
 0x372   :  { %v181_v59 = vmul.f32 %v179_v58, %v172_v57 }
 0x374   :  { %183 = vrot.lane.b32.xlu1 %v181_v59, %s673_s27 }
 0x3e6   :  { %v184_v62 = vpop.permute.xlu1 %183 }
 0x3e7   :  { %v186_v63 = vadd.f32 %v184_v62, %v176_v61 }
 0x3e9   :  { %619 = vtanh.f32 %v186_v63  ;;  %v231_v28 = vrot.slane %v186_v63, 7 }
 0x3f3   :  { %v620_v0 = vpop.eup %619 }
 0x3f4   :  { %189 = vrot.lane.b32.xlu0 %v620_v0, %s676_s1 }
 0x466   :  { %v190_v1 = vpop.permute.xlu0 %189 }
 0x467   :  { %v192_v2 = vmul.f32 %v190_v1, %v172_v57  ;;  %v284_v57 = vrot.slane %v731_v22, 5 }
 0x469   :  { %202 = vperm.xlu0 %588, %v192_v2   ;;  %195 = vperm.xlu1 %591, %v192_v2  }
 0x46d   :  { %593 = vset.pattern.permute.xlu0 %v678_v36  ;;  %592 = vset.pattern.permute.xlu1 %v677_v35 }
 0x46e   :  { %212 = vperm.xlu0 %593, %v192_v2   ;;  %207 = vperm.xlu1 %592, %v192_v2  }
 0x472   :  { %595 = vset.pattern.permute.xlu0 %v674_v30  ;;  %594 = vset.pattern.permute.xlu1 %v675_v31 }
 0x4e8   :  { %v203_v3 = vpop.permute.xlu0 %202  ;;  %v196_v5 = vpop.permute.xlu1 %195 }
 0x4e9   :  { %v205_v6 = vmul.f32 %v203_v3, %v714_v9  ;;  %v200_v7 = vmul.f32 %v767_v4, %v196_v5 }
 0x4eb   :  { %v216_v13 = vadd.f32 %v205_v6, %v200_v7  ;;  %v800_v7 = vrot.slane %v714_v9, 5 }
 0x4ed   :  { %v213_v8 = vpop.permute.xlu0 %212  ;;  %v208_v10 = vpop.permute.xlu1 %207 }
 0x4ee   :  { %v215_v11 = vmul.f32 %v213_v8, %v747_v41  ;;  %v210_v12 = vmul.f32 %v208_v10, %v744_v38 }
 0x4f0   :  { %v217_v14 = vadd.f32 %v215_v11, %v210_v12 }
 0x4f2   :  { %v218_v15 = vadd.f32 %v217_v14, %v216_v13 }
 0x4f4   :  { %v220_v16 = vrot.slane %v218_v15, 7 }
 0x4f6   :  { %v222_v18 = vadd.f32 %v220_v16, %v720_v17 }
 0x4f8   :  { %621 = vtanh.f32 %v222_v18 }
 0x502   :  { %v622_v23 = vpop.eup %621 }
 0x503   :  { %v226_v24 = vmul.f32 %v622_v23, %v224_v19 }
 0x505   :  { %v229_v25 = vadd.f32 %v227_v21, %v226_v24  ;;  %v338_v24 = vrot.slane %v726_v20, 4 }
 0x507   :  { %235 = vrot.lane.b32.xlu1 %v229_v25, %s672_s26  ;;  %v233_v29 = vmul.f32 %v231_v28, %v229_v25 }
 0x579   :  { %v236_v26 = vpop.permute.xlu1 %235 }
 0x57a   :  { %v238_v27 = vmul.f32 %v236_v26, %v229_v25 }
 0x57c   :  { %240 = vrot.lane.b32.xlu1 %v238_v27, %s673_s27 }
 0x5ee   :  { %v241_v32 = vpop.permute.xlu1 %240 }
 0x5ef   :  { %v243_v33 = vadd.f32 %v241_v32, %v233_v29 }
 0x5f1   :  { %623 = vtanh.f32 %v243_v33 }
 0x5fb   :  { %v624_v34 = vpop.eup %623 }
 0x5fc   :  { %246 = vrot.lane.b32.xlu0 %v624_v34, %s676_s1 }
 0x66e   :  { %v247_v37 = vpop.permute.xlu0 %246 }
 0x66f   :  { %v249_v39 = vmul.f32 %v247_v37, %v229_v25  ;;  %v341_v25 = vrot.slane %v731_v22, 4 }
 0x671   :  { %259 = vperm.xlu0 %595, %v249_v39   ;;  %252 = vperm.xlu1 %594, %v249_v39  }
 0x675   :  { %596 = vset.pattern.permute.xlu1 %v677_v35 }
 0x676   :  { %264 = vperm.xlu1 %596, %v249_v39  }
 0x67a   :  { %597 = vset.pattern.permute.xlu1 %v678_v36 }
 0x67b   :  { %269 = vperm.xlu1 %597, %v249_v39  }
 0x67f   :  { %598 = vset.pattern.permute.xlu1 %v675_v31 }
 0x6f0   :  { %v253_v40 = vpop.permute.xlu1 %252  ;;  %v260_v45 = vpop.permute.xlu0 %259 }
 0x6f1   :  { %v262_v46 = vmul.f32 %v260_v45, %v767_v4  ;;  %v257_v47 = vmul.f32 %v783_v43, %v253_v40 }
 0x6f3   :  { %v273_v51 = vadd.f32 %v262_v46, %v257_v47  ;;  %v816_v47 = vrot.slane %v714_v9, 4 }
 0x6f5   :  { %v265_v44 = vpop.permute.xlu1 %264 }
 0x6f6   :  { %v267_v49 = vmul.f32 %v265_v44, %v714_v9 }
 0x6fa   :  { %v270_v48 = vpop.permute.xlu1 %269 }
 0x6fb   :  { %v272_v50 = vmul.f32 %v270_v48, %v744_v38  ;;  %v288_v38 = vrot.slane %v243_v33, 7 }
 0x6fd   :  { %v274_v52 = vadd.f32 %v272_v50, %v267_v49 }
 0x6ff   :  { %v275_v53 = vadd.f32 %v274_v52, %v273_v51 }
 0x701   :  { %v277_v54 = vrot.slane %v275_v53, 7 }
 0x703   :  { %v279_v55 = vadd.f32 %v277_v54, %v720_v17 }
 0x705   :  { %625 = vtanh.f32 %v279_v55 }
 0x70f   :  { %v626_v58 = vpop.eup %625 }
 0x710   :  { %v283_v59 = vmul.f32 %v626_v58, %v281_v56 }
 0x712   :  { %v286_v60 = vadd.f32 %v284_v57, %v283_v59 }
 0x714   :  { %292 = vrot.lane.b32.xlu0 %v286_v60, %s672_s26  ;;  %v290_v63 = vmul.f32 %v288_v38, %v286_v60 }
 0x786   :  { %v293_v61 = vpop.permute.xlu0 %292 }
 0x787   :  { %v295_v62 = vmul.f32 %v293_v61, %v286_v60 }
 0x789   :  { %297 = vrot.lane.b32.xlu1 %v295_v62, %s673_s27 }
 0x7fb   :  { %v298_v0 = vpop.permute.xlu1 %297 }
 0x7fc   :  { %v300_v1 = vadd.f32 %v298_v0, %v290_v63 }
 0x7fe   :  { %627 = vtanh.f32 %v300_v1  ;;  %v345_v33 = vrot.slane %v300_v1, 7 }
 0x808   :  { %v628_v2 = vpop.eup %627 }
 0x809   :  { %303 = vrot.lane.b32.xlu0 %v628_v2, %s676_s1 }
 0x87b   :  { %v304_v3 = vpop.permute.xlu0 %303 }
 0x87c   :  { %v306_v5 = vmul.f32 %v304_v3, %v286_v60  ;;  %v398_v60 = vrot.slane %v731_v22, 3 }
 0x87e   :  { %316 = vperm.xlu0 %595, %v306_v5   ;;  %309 = vperm.xlu1 %598, %v306_v5  }
 0x882   :  { %600 = vset.pattern.permute.xlu0 %v678_v36  ;;  %599 = vset.pattern.permute.xlu1 %v677_v35 }
 0x883   :  { %326 = vperm.xlu0 %600, %v306_v5   ;;  %321 = vperm.xlu1 %599, %v306_v5  }
 0x887   :  { %602 = vset.pattern.permute.xlu0 %v674_v30  ;;  %601 = vset.pattern.permute.xlu1 %v675_v31 }
 0x8fd   :  { %v317_v6 = vpop.permute.xlu0 %316  ;;  %v310_v8 = vpop.permute.xlu1 %309 }
 0x8fe   :  { %v319_v10 = vmul.f32 %v317_v6, %v783_v43  ;;  %v314_v11 = vmul.f32 %v800_v7, %v310_v8 }
 0x900   :  { %v330_v16 = vadd.f32 %v319_v10, %v314_v11 }
 0x902   :  { %v327_v12 = vpop.permute.xlu0 %326  ;;  %v322_v13 = vpop.permute.xlu1 %321 }
 0x903   :  { %v329_v14 = vmul.f32 %v327_v12, %v714_v9  ;;  %v324_v15 = vmul.f32 %v322_v13, %v767_v4  ;;  %v395_v9 = vrot.slane %v726_v20, 3 }
 0x905   :  { %v331_v18 = vadd.f32 %v329_v14, %v324_v15 }
 0x907   :  { %v332_v19 = vadd.f32 %v331_v18, %v330_v16 }
 0x909   :  { %v334_v21 = vrot.slane %v332_v19, 7 }
 0x90b   :  { %v336_v23 = vadd.f32 %v334_v21, %v720_v17 }
 0x90d   :  { %629 = vtanh.f32 %v336_v23 }
 0x917   :  { %v630_v26 = vpop.eup %629 }
 0x918   :  { %v340_v27 = vmul.f32 %v630_v26, %v338_v24 }
 0x91a   :  { %v343_v28 = vadd.f32 %v341_v25, %v340_v27  ;;  %v453_v25 = vrot.slane %v731_v22, 2 }
 0x91c   :  { %349 = vrot.lane.b32.xlu1 %v343_v28, %s672_s26  ;;  %v347_v34 = vmul.f32 %v345_v33, %v343_v28 }
 0x98e   :  { %v350_v29 = vpop.permute.xlu1 %349 }
 0x98f   :  { %v352_v32 = vmul.f32 %v350_v29, %v343_v28 }
 0x991   :  { %354 = vrot.lane.b32.xlu1 %v352_v32, %s673_s27 }
 0xa03   :  { %v355_v37 = vpop.permute.xlu1 %354 }
 0xa04   :  { %v357_v39 = vadd.f32 %v355_v37, %v347_v34 }
 0xa06   :  { %631 = vtanh.f32 %v357_v39 }
 0xa10   :  { %v632_v40 = vpop.eup %631 }
 0xa11   :  { %360 = vrot.lane.b32.xlu0 %v632_v40, %s676_s1 }
 0xa83   :  { %v361_v44 = vpop.permute.xlu0 %360 }
 0xa84   :  { %v363_v45 = vmul.f32 %v361_v44, %v343_v28 }
 0xa86   :  { %373 = vperm.xlu0 %602, %v363_v45   ;;  %366 = vperm.xlu1 %601, %v363_v45  }
 0xa8a   :  { %603 = vset.pattern.permute.xlu1 %v677_v35 }
 0xa8b   :  { %378 = vperm.xlu1 %603, %v363_v45  }
 0xa8f   :  { %604 = vset.pattern.permute.xlu1 %v678_v36 }
 0xa90   :  { %383 = vperm.xlu1 %604, %v363_v45  }
 0xa94   :  { %605 = vset.pattern.permute.xlu1 %v675_v31 }
 0xb05   :  { %v367_v46 = vpop.permute.xlu1 %366  ;;  %v374_v49 = vpop.permute.xlu0 %373 }
 0xb06   :  { %v376_v50 = vmul.f32 %v374_v49, %v800_v7  ;;  %v371_v51 = vmul.f32 %v816_v47, %v367_v46 }
 0xb08   :  { %v387_v55 = vadd.f32 %v376_v50, %v371_v51 }
 0xb0a   :  { %v379_v48 = vpop.permute.xlu1 %378 }
 0xb0b   :  { %v381_v53 = vmul.f32 %v379_v48, %v783_v43 }
 0xb0f   :  { %v384_v52 = vpop.permute.xlu1 %383 }
 0xb10   :  { %v386_v54 = vmul.f32 %v384_v52, %v767_v4  ;;  %v402_v4 = vrot.slane %v357_v39, 7 }
 0xb12   :  { %v388_v56 = vadd.f32 %v386_v54, %v381_v53 }
 0xb14   :  { %v389_v57 = vadd.f32 %v388_v56, %v387_v55 }
 0xb16   :  { %v391_v58 = vrot.slane %v389_v57, 7 }
 0xb18   :  { %v393_v59 = vadd.f32 %v391_v58, %v720_v17  ;;  %v508_v58 = vrot.slane %v731_v22, 1 }
 0xb1a   :  { %633 = vtanh.f32 %v393_v59 }
 0xb24   :  { %v634_v61 = vpop.eup %633 }
 0xb25   :  { %v397_v62 = vmul.f32 %v634_v61, %v395_v9 }
 0xb27   :  { %v400_v38 = vadd.f32 %v398_v60, %v397_v62 }
 0xb29   :  { %406 = vrot.lane.b32.xlu0 %v400_v38, %s672_s26  ;;  %v404_v1 = vmul.f32 %v402_v4, %v400_v38 }
 0xb9b   :  { %v407_v63 = vpop.permute.xlu0 %406 }
 0xb9c   :  { %v409_v0 = vmul.f32 %v407_v63, %v400_v38 }
 0xb9e   :  { %411 = vrot.lane.b32.xlu1 %v409_v0, %s673_s27 }
 0xc10   :  { %v412_v2 = vpop.permute.xlu1 %411 }
 0xc11   :  { %v414_v3 = vadd.f32 %v412_v2, %v404_v1 }
 0xc13   :  { %635 = vtanh.f32 %v414_v3  ;;  %v457_v32 = vrot.slane %v414_v3, 7 }
 0xc1d   :  { %v636_v5 = vpop.eup %635 }
 0xc1e   :  { %417 = vrot.lane.b32.xlu0 %v636_v5, %s676_s1 }
 0xc90   :  { %v418_v6 = vpop.permute.xlu0 %417 }
 0xc91   :  { %v420_v8 = vmul.f32 %v418_v6, %v400_v38 }
 0xc93   :  { %428 = vperm.xlu0 %602, %v420_v8   ;;  %423 = vperm.xlu1 %605, %v420_v8  }
 0xc97   :  { %607 = vset.pattern.permute.xlu0 %v678_v36  ;;  %606 = vset.pattern.permute.xlu1 %v677_v35 }
 0xc98   :  { %438 = vperm.xlu0 %607, %v420_v8   ;;  %433 = vperm.xlu1 %606, %v420_v8  }
 0xc9c   :  { %609 = vset.pattern.permute.xlu0 %v674_v30  ;;  %608 = vset.pattern.permute.xlu1 %v675_v31  ;;  %v450_v31 = vrot.slane %v726_v20, 2 }
 0xd12   :  { %v429_v10 = vpop.permute.xlu0 %428  ;;  %v424_v11 = vpop.permute.xlu1 %423 }
 0xd13   :  { %v431_v12 = vmul.f32 %v429_v10, %v816_v47  ;;  %v426_v13 = vmul.f32 %v424_v11, %v750_v42 }
 0xd15   :  { %v442_v19 = vadd.f32 %v431_v12, %v426_v13 }
 0xd17   :  { %v439_v14 = vpop.permute.xlu0 %438  ;;  %v434_v15 = vpop.permute.xlu1 %433 }
 0xd18   :  { %v441_v16 = vmul.f32 %v439_v14, %v783_v43  ;;  %v436_v18 = vmul.f32 %v434_v15, %v800_v7 }
 0xd1a   :  { %v443_v21 = vadd.f32 %v441_v16, %v436_v18 }
 0xd1c   :  { %v444_v23 = vadd.f32 %v443_v21, %v442_v19 }
 0xd1e   :  { %v446_v24 = vrot.slane %v444_v23, 7 }
 0xd20   :  { %v448_v30 = vadd.f32 %v446_v24, %v720_v17 }
 0xd22   :  { %637 = vtanh.f32 %v448_v30 }
 0xd2c   :  { %v638_v26 = vpop.eup %637 }
 0xd2d   :  { %v452_v27 = vmul.f32 %v638_v26, %v450_v31 }
 0xd2f   :  { %v455_v28 = vadd.f32 %v453_v25, %v452_v27 }
 0xd31   :  { %461 = vrot.lane.b32.xlu1 %v455_v28, %s672_s26  ;;  %v459_v33 = vmul.f32 %v457_v32, %v455_v28 }
 0xda3   :  { %v462_v29 = vpop.permute.xlu1 %461 }
 0xda4   :  { %v464_v43 = vmul.f32 %v462_v29, %v455_v28 }
 0xda6   :  { %466 = vrot.lane.b32.xlu1 %v464_v43, %s673_s27 }
 0xe18   :  { %v467_v34 = vpop.permute.xlu1 %466 }
 0xe19   :  { %v469_v37 = vadd.f32 %v467_v34, %v459_v33 }
 0xe1b   :  { %639 = vtanh.f32 %v469_v37 }
 0xe25   :  { %v640_v39 = vpop.eup %639 }
 0xe26   :  { %472 = vrot.lane.b32.xlu0 %v640_v39, %s676_s1 }
 0xe98   :  { %v473_v40 = vpop.permute.xlu0 %472 }
 0xe99   :  { %v475_v44 = vmul.f32 %v473_v40, %v455_v28 }
 0xe9b   :  { %483 = vperm.xlu0 %609, %v475_v44   ;;  %478 = vperm.xlu1 %608, %v475_v44  }
 0xe9f   :  { %610 = vset.pattern.permute.xlu1 %v677_v35  ;;  %612 = vset.pattern.permute.xlu0 %v678_v36 }
 0xea0   :  { %488 = vperm.xlu1 %610, %v475_v44  }
 0xea4   :  { %611 = vset.pattern.permute.xlu1 %v678_v36  ;;  %v505_v36 = vrot.slane %v726_v20, 1 }
 0xea5   :  { %493 = vperm.xlu1 %611, %v475_v44  }
 0xf1a   :  { %v479_v45 = vpop.permute.xlu1 %478  ;;  %v484_v48 = vpop.permute.xlu0 %483 }
 0xf1b   :  { %v486_v49 = vmul.f32 %v484_v48, %v750_v42  ;;  %v481_v50 = vmul.f32 %v479_v45, %v747_v41 }
 0xf1d   :  { %v497_v54 = vadd.f32 %v486_v49, %v481_v50 }
 0xf1f   :  { %v489_v46 = vpop.permute.xlu1 %488 }
 0xf20   :  { %v491_v52 = vmul.f32 %v489_v46, %v816_v47 }
 0xf24   :  { %v494_v51 = vpop.permute.xlu1 %493 }
 0xf25   :  { %v496_v53 = vmul.f32 %v494_v51, %v800_v7  ;;  %v512_v7 = vrot.slane %v469_v37, 7 }
 0xf27   :  { %v498_v35 = vadd.f32 %v496_v53, %v491_v52 }
 0xf29   :  { %v499_v55 = vadd.f32 %v498_v35, %v497_v54 }
 0xf2b   :  { %v501_v56 = vrot.slane %v499_v55, 7 }
 0xf2d   :  { %v503_v57 = vadd.f32 %v501_v56, %v720_v17 }
 0xf2f   :  { %641 = vtanh.f32 %v503_v57 }
 0xf39   :  { %v642_v59 = vpop.eup %641 }
 0xf3a   :  { %v507_v42 = vmul.f32 %v642_v59, %v505_v36 }
 0xf3c   :  { %v510_v9 = vadd.f32 %v508_v58, %v507_v42 }
 0xf3e   :  { %516 = vrot.lane.b32.xlu0 %v510_v9, %s672_s26  ;;  %v514_v60 = vmul.f32 %v512_v7, %v510_v9 }
 0xfb0   :  { %v517_v41 = vpop.permute.xlu0 %516 }
 0xfb1   :  { %v519_v47 = vmul.f32 %v517_v41, %v510_v9 }
 0xfb3   :  { %521 = vrot.lane.b32.xlu1 %v519_v47, %s673_s27 }
0x1025   :  { %v522_v61 = vpop.permute.xlu1 %521 }
0x1026   :  { %v524_v62 = vadd.f32 %v522_v61, %v514_v60 }
0x1028   :  { %643 = vtanh.f32 %v524_v62 }
0x1032   :  { %v644_v17 = vpop.eup %643 }
0x1033   :  { %527 = vrot.lane.b32.xlu0 %v644_v17, %s676_s1 }
0x10a5   :  { %v528_v20 = vpop.permute.xlu0 %527 }
0x10a6   :  { %v530_v38 = vmul.f32 %v528_v20, %v510_v9 }
0x10a8   :  { %532 = vrot.lane.b32.xlu1 %v530_v38, %s679_s28 }
0x111a   :  { %v533_v22 = vpop.permute.xlu1 %532 }
0x111b   :  { %536 = vst.msk [vmem:[#allocation2 - $0x7] sm:$0x80] %vm535_vm2, %v533_v22 }
0x111c   :  { %656 = shalt.err (!%p653_p4)
}
0x111d   :  { %s657_s7 = scalar_lea.hbm %s869_s2, 16 }
0x111e   :  { %p658_p5 = scmp.ne.s32.totalorder %s869_s2, %s657_s7  ;;  %p661_p6 = scmp.lt.u32.totalorder %s657_s7, %s869_s2 }
0x1120   :  { %p663_p7 = pnand %p661_p6, %p658_p5 }
0x1122   :  { %666 = shalt.err (!%p663_p7)
}
0x1123   :  { %546 = dma.vmem_to_hbm [thread:$0]  %s544_s30, 16, %s869_s2, [#allocation3]  }
0x1124   :  { %667 = dma.done.wait [#allocation3], 16  }
0x1125   :  { %668 = vsyncadd [#allocation3], 4294967280 }
0x1126   :  { %550 = vsyncpa [#allocation3], 1 }

</bundles_post_ra>
